<compile_context>
chip_gen: v6e
topology: v6e:2x2x1
jax: 0.10.0
libtpu: 0.0.40
codegen_flags: <defaults>
</compile_context>

<pallas_src>
import functools

import jax
import jax.numpy as jnp
from jax.experimental import pallas as pl
from jax.experimental.pallas import tpu as pltpu


def _rmsnorm_kernel(x_ref, w_ref, o_ref, *, eps: float, inv_dim: float,
                    cast_to_x_dtype: bool):
    # x_ref: (tm, Dp) tile of input rows, w_ref: (1, Dp) f32 weight, o_ref: (tm, Dp)
    x32 = x_ref[...].astype(jnp.float32)                       # x.float()
    # sum/dim instead of mean so zero-padded lanes (Dp > dim) don't bias it.
    ms = jnp.sum(x32 * x32, axis=-1, keepdims=True) * inv_dim  # mean(x^2, -1)
    normed32 = x32 * jax.lax.rsqrt(ms + eps)                    # x * rsqrt(...)
    if cast_to_x_dtype:
        # Match PyTorch: .type_as(x) before multiplying by the weight.
        normed32 = normed32.astype(x_ref.dtype).astype(jnp.float32)
    o_ref[...] = (normed32 * w_ref[...]).astype(o_ref.dtype)


def _sublane_multiple(itemsize: int) -> int:
    # Sublane packing for the input dtype: f32 -> 8, bf16/f16 -> 16, 1B -> 32.
    return {4: 8, 2: 16, 1: 32}.get(itemsize, 8)


def _vmem_limit_bytes() -> int:
    # Generation-aware scoped-VMEM budget: ~75% of physical capacity, capped
    # at ~96 MiB on 128 MiB parts (v5e/v6e) and ~48 MiB on 64 MiB parts (v7x).
    try:
        cap = pltpu.get_tpu_info().vmem_capacity_bytes
    except Exception:
        cap = 64 * 1024 * 1024  # conservative fallback: v7x per-TC VMEM
    return min(int(cap * 3 // 4), 96 * 1024 * 1024)


def rmsnorm(x: jax.Array, weight: jax.Array, eps: float, *,
            block_rows: int | None = None, out_dtype=None):
    """RMSNorm over the last axis of x, matching the PyTorch module semantics.

    out_dtype: optional override of the output dtype. Default follows torch
    promotion (normed.type_as(x) * weight), i.e. result_type(x, weight).
    """
    orig_shape = x.shape
    dim = orig_shape[-1]
    assert weight.shape == (dim,)

    rows = 1
    for s in orig_shape[:-1]:
        rows *= s

    if out_dtype is None:
        out_dtype = jnp.result_type(x.dtype, weight.dtype)
    out_dtype = jnp.dtype(out_dtype)

    # Pad the hidden dim to a multiple of 128 (lane-dense, unmasked stores).
    dim_p = ((dim + 127) // 128) * 128
    x2d = x.reshape(rows, dim)
    w2d = weight.astype(jnp.float32).reshape(1, dim)  # pre-cast once in wrapper
    if dim_p != dim:
        pad = dim_p - dim
        x2d = jnp.pad(x2d, ((0, 0), (0, pad)))
        w2d = jnp.pad(w2d, ((0, 0), (0, pad)))

    in_bytes = jnp.dtype(x.dtype).itemsize
    out_bytes = out_dtype.itemsize
    sublane = _sublane_multiple(in_bytes)

    vmem_limit = _vmem_limit_bytes()

    if block_rows is None:
        # ~2 MiB input tiles per grid step (memory-bound streaming op).
        tm_target = max(sublane, (2 * 1024 * 1024) // (dim_p * in_bytes))
        # VMEM per row: double-buffered input + output tiles PLUS the f32
        # intermediates the kernel body materializes (~2 live f32 copies).
        usable = int(vmem_limit * 0.7)
        bytes_per_row = dim_p * (2 * (in_bytes + out_bytes) + 8)
        tm_vmem_cap = max(sublane, usable // bytes_per_row)
        tm = min(tm_target, tm_vmem_cap, rows)
        # Pipeline depth: >= 8 grid steps when rows allow (>= 4 steps per TC
        # on v7x megacore; real DMA/compute overlap on single-TC v5e/v6e).
        if rows >= 8 * sublane:
            tm = min(tm, rows // 8)
        elif rows >= 2 * sublane:
            tm = min(tm, pl.cdiv(rows, 2))
        # Align to the sublane packing for the input dtype.
        tm = max(sublane, (tm // sublane) * sublane)
        tm = min(tm, rows)
    else:
        tm = min(block_rows, rows)

    grid = pl.cdiv(rows, tm)

    kernel = functools.partial(
        _rmsnorm_kernel,
        eps=eps,
        inv_dim=1.0 / float(dim),
        cast_to_x_dtype=(jnp.dtype(x.dtype) != jnp.dtype(jnp.float32)),
    )

    out2d = pl.pallas_call(
        kernel,
        out_shape=jax.ShapeDtypeStruct((rows, dim_p), out_dtype),
        grid_spec=pltpu.PrefetchScalarGridSpec(
            num_scalar_prefetch=0,
            grid=(grid,),
            in_specs=[
                pl.BlockSpec((tm, dim_p), lambda i: (i, 0)),
                pl.BlockSpec((1, dim_p), lambda i: (0, 0)),  # weight resident in VMEM
            ],
            out_specs=pl.BlockSpec((tm, dim_p), lambda i: (i, 0)),
        ),
        compiler_params=pltpu.CompilerParams(
            dimension_semantics=("parallel",),
            vmem_limit_bytes=vmem_limit,
        ),
    )(x2d, w2d)

    if dim_p != dim:
        out2d = out2d[:, :dim]
    return out2d.reshape(orig_shape[:-1] + (dim,))


if __name__ == "__main__":
    batch, seq, hidden = 2, 8, 128
    eps = 1e-5

    key = jax.random.PRNGKey(0)
    x = jax.random.normal(key, (batch, seq, hidden), dtype=jnp.float32)

    # Deterministic parameter init, matching nn.Parameter(torch.ones(dim)).
    weight = jnp.ones((hidden,), dtype=jnp.float32)

    out = rmsnorm(x, weight, eps)
    out = jax.block_until_ready(out)

    # Sanity check against a pure-JAX reference (same math as the PyTorch module).
    x32 = x.astype(jnp.float32)
    ref = (x32 * jax.lax.rsqrt(jnp.mean(x32 * x32, -1, keepdims=True) + eps)).astype(
        x.dtype
    ) * weight
    assert jnp.allclose(out, ref, atol=1e-5, rtol=1e-5)

    # Low-precision path (.type_as(x) round-trip kept), bf16 weight -> bf16 out.
    xb = x.astype(jnp.bfloat16)
    wb = weight.astype(jnp.bfloat16)
    out_b = jax.block_until_ready(rmsnorm(xb, wb, eps))
    xb32 = xb.astype(jnp.float32)
    ref_b = (
        (xb32 * jax.lax.rsqrt(jnp.mean(xb32 * xb32, -1, keepdims=True) + eps))
        .astype(jnp.bfloat16)
        .astype(jnp.float32)
        * wb.astype(jnp.float32)
    ).astype(jnp.bfloat16)
    assert jnp.allclose(
        out_b.astype(jnp.float32), ref_b.astype(jnp.float32), atol=1e-2, rtol=1e-2
    )

    # out_dtype override: bf16 x with f32 weight, but keep bf16 output
    # (avoids the f32 output promotion / doubled store traffic).
    out_o = jax.block_until_ready(rmsnorm(xb, weight, eps, out_dtype=jnp.bfloat16))
    ref_o = (
        (xb32 * jax.lax.rsqrt(jnp.mean(xb32 * xb32, -1, keepdims=True) + eps))
        .astype(jnp.bfloat16)
        .astype(jnp.float32)
        * weight
    ).astype(jnp.bfloat16)
    assert jnp.allclose(
        out_o.astype(jnp.float32), ref_o.astype(jnp.float32), atol=1e-2, rtol=1e-2
    )

    # Non-128-multiple hidden dim exercises the lane-padding path.
    hid2 = 96
    x2 = jax.random.normal(jax.random.PRNGKey(1), (batch, seq, hid2), jnp.float32)
    w2 = jnp.ones((hid2,), jnp.float32)
    out2 = jax.block_until_ready(rmsnorm(x2, w2, eps))
    ref2 = (x2 * jax.lax.rsqrt(jnp.mean(x2 * x2, -1, keepdims=True) + eps)) * w2
    assert jnp.allclose(out2, ref2, atol=1e-5, rtol=1e-5)

    print("KERNEL_OK")
</pallas_src>

<mosaic_0001>
module attributes {stable_mosaic.version = 11 : i64} {
  func.func @_rmsnorm_kernel(%arg0: i32, %arg1: memref<8x128xf32, #tpu.memory_space<vmem>>, %arg2: memref<1x128xf32, #tpu.memory_space<vmem>>, %arg3: memref<8x128xf32, #tpu.memory_space<vmem>>) attributes {dimension_semantics = [#tpu.dimension_semantics<parallel>], iteration_bounds = array<i64: 2>, scalar_prefetch = 0 : i64, scratch_operands = 0 : i64, tpu.core_type = #tpu.core_type<tc>, window_params = [{transform_indices = @transform_0, window_bounds = array<i64: 8, 128>}, {pipeline_mode = #tpu.pipeline_mode<synchronous>, transform_indices = @transform_1, window_bounds = array<i64: 1, 128>}, {transform_indices = @transform_2, window_bounds = array<i64: 8, 128>}]} {
    %c0 = arith.constant 0 : index
    %c0_0 = arith.constant 0 : index
    %0 = vector.load %arg1[%c0, %c0_0] : memref<8x128xf32, #tpu.memory_space<vmem>>, vector<8x128xf32>
    %1 = arith.mulf %0, %0 : vector<8x128xf32>
    %cst = arith.constant dense<0.000000e+00> : vector<8xf32>
    %2 = vector.multi_reduction <add>, %1, %cst [1] : vector<8x128xf32> to vector<8xf32>
    %3 = vector.shape_cast %2 : vector<8xf32> to vector<8x1xf32>
    %cst_1 = arith.constant 7.812500e-03 : f32
    %4 = vector.broadcast %cst_1 : f32 to vector<8x1xf32>
    %5 = arith.mulf %3, %4 : vector<8x1xf32>
    %cst_2 = arith.constant 9.99999974E-6 : f32
    %6 = vector.broadcast %cst_2 : f32 to vector<8x1xf32>
    %7 = arith.addf %5, %6 : vector<8x1xf32>
    %8 = math.rsqrt %7 : vector<8x1xf32>
    %9 = vector.broadcast %8 : vector<8x1xf32> to vector<8x128xf32>
    %10 = arith.mulf %0, %9 : vector<8x128xf32>
    %c0_3 = arith.constant 0 : index
    %c0_4 = arith.constant 0 : index
    %11 = vector.load %arg2[%c0_3, %c0_4] : memref<1x128xf32, #tpu.memory_space<vmem>>, vector<1x128xf32>
    %12 = vector.broadcast %11 : vector<1x128xf32> to vector<8x128xf32>
    %13 = arith.mulf %10, %12 : vector<8x128xf32>
    %c0_5 = arith.constant 0 : index
    %c0_6 = arith.constant 0 : index
    %14 = vector.load %arg3[%c0_5, %c0_6] : memref<8x128xf32, #tpu.memory_space<vmem>>, vector<8x128xf32>
    tpu.vector_store %arg3[%c0_5, %c0_6], %13 {strides = array<i32>} : memref<8x128xf32, #tpu.memory_space<vmem>>, vector<8x128xf32>,
    return
  }
  func.func @transform_0(%arg0: i32) -> (i32, i32) {
    %c0_i32 = arith.constant 0 : i32
    %c0_i32_0 = arith.constant 0 : i32
    return %arg0, %c0_i32 : i32, i32
  }
  func.func @transform_1(%arg0: i32) -> (i32, i32) {
    %c0_i32 = arith.constant 0 : i32
    %c0_i32_0 = arith.constant 0 : i32
    %c0_i32_1 = arith.constant 0 : i32
    return %c0_i32, %c0_i32_0 : i32, i32
  }
  func.func @transform_2(%arg0: i32) -> (i32, i32) {
    %c0_i32 = arith.constant 0 : i32
    %c0_i32_0 = arith.constant 0 : i32
    return %arg0, %c0_i32 : i32, i32
  }
}

</mosaic_0001>

<bundles_post_ra>
// kernel: tpu_custom_call.1
= control target key start
LH: loop header
LB: loop body
LE: loop exit
PB: predicated region body
PF: predicated region fallthrough
CT: control target
= control target key end

     0   :  { %7 = vsyncpa [#allocation3], 0  ;;  %s576_s0 = inlined_call_operand.hbm [shape: f32[16,128], index: 0, kind: input, shape index: {}]   ;;  %s577_s1 = inlined_call_operand.vmem [shape: f32[1,128], index: 1, kind: input, shape index: {}]   ;;  %s578_s2 = inlined_call_operand.hbm [shape: f32[16,128], index: 2, kind: output, shape index: {}]  }
   0x1   :  { %9 = vsyncpa [#allocation3 + $0x1], 0 }
   0x2   :  { %10 = vsyncpa [#allocation4], 0 }
   0x3   :  { %12 = vsyncpa [#allocation4 + $0x1], 0  ;;  %s432_s9 = smov 0   ;;  %s434_s10 = smov 0  }
   0x4   :  { %s436_s11 = smov 0   ;;  %s438_s12 = smov 0  }
   0x5 LB: > { %s453_s13 = sadd.s32 4294967295, %s413_s12   ;;  %s260_s14 = sadd.s32 4294967294, %s413_s12   ;;  %s413_s12 = sphi %s438_s12, %s595_s12   ;;  %s409_s11 = sphi %s436_s11, %s594_s11   ;;  %s405_s10 = sphi %s434_s10, %s593_s10   ;;  %s401_s9 = sphi %s432_s9, %s592_s9  }
   0x6   : > { %s457_s15 = sadd.s32 1, %s413_s12   ;;  %s25_s16 = sadd.s32 1, %s409_s11 }
   0x7   : > { %s22_s17 = ssub.s32 %s413_s12, %s457_s15  ;;  %p32_p0 = scmp.ne.s32.totalorder %s409_s11, %s405_s10 }
   0x8   : > { %p23_p1 = scmp.eq.s32.totalorder %s22_s17, 0  ;;  %p33_p2 = scmp.eq.s32.totalorder %s413_s12, 0 }
   0x9   : > { %p38_p3 = scmp.ne.s32.totalorder %s405_s10, %s401_s9  ;;  %p39_p4 = scmp.eq.s32.totalorder %s453_s13, 0 }
   0xa   : > { %s469_s18 = scalar_select %p23_p1, %s409_s11, %s25_s16  }
   0xb   : > { %p471_p5 = por %p33_p2, %p32_p0  ;;  %p475_p6 = por %p39_p4, %p38_p3 }
   0xc   : > { %p83_p7 = scmp.eq.s32.totalorder %s453_s13, 1  ;;  %p89_p8 = scmp.eq.s32.totalorder %s260_s14, 1 }
   0xd   : > { %s582_s20 = scalar_select %p475_p6, 1, 0 }
   0xe   : > { %p285_p10 = scmp.lt.s32.totalorder %s413_s12, 2  ;;  %p482_p11 = por %p83_p7, %p32_p0 }
   0xf   : > { %p486_p12 = por %p89_p8, %p38_p3  ;;  %s112_s23 = sand.u32 1, %s409_s11  }
  0x10   : > { %s583_s21 = scalar_select %p482_p11, 1, 0 }
  0x11   : > { %s584_s22 = scalar_select %p486_p12, 1, 0 }
  0x12   : > { %s264_s24 = sshll.u32 %s413_s12, 7  ;;  %s263_s25 = sshll.u32 %s112_s23, 3 }
  0x13   : > { %s495_s28 = scalar_lea.hbm %s576_s0, %s264_s24  ;;  %s116_s29 = scalar_lea.vmem [#allocation2], %s263_s25 }
  0x14   : > { %s123_s30 = sshll.u32 %s116_s29, 4  ;;  %p499_p13 = pnand %p285_p10, %p471_p5  ;;  %s503_s30 = int_to_ptr.vmem [resolvable:$true] %s123_s30 }
  0x15   : > { %s113_s4 = scalar_lea.sflag [#allocation3], %s112_s23  ;;  %s321_s5 = scalar_lea.hbm %s495_s28, 128 }
  0x16   : > { %p322_p2 = scmp.ne.s32.totalorder %s495_s28, %s321_s5  ;;  %p323_p3 = pneg %p499_p13 }
  0x17   : > { %s326_s8 = scalar_lea.hbm %s576_s0, 256  ;;  %p327_p5 = scmp.lt.s32.totalorder %s495_s28, %s576_s0 }
  0x18   : > { %p324_p4 = pnand %p323_p3, %p322_p2  ;;  %p328_p8 = scmp.lt.s32.totalorder %s326_s8, %s321_s5 }
  0x1a   : > { %p325_p7 = pneg %p324_p4  ;;  %p329_p10 = por %p328_p8, %p327_p5 }
  0x1c   : > { %p330_p9 = pnand %p329_p10, %p325_p7 }
  0x1e   : > { %333 = shalt.err (!%p330_p9)
}
  0x1f   : > { %s334_s17 = scalar_lea.vmem %s503_s30, 128  ;;  %s415_s19 = smov [#allocation2]  }
  0x20   : > { %p335_p0 = scmp.ne.s32.totalorder %s503_s30, %s334_s17  ;;  %s339_s23 = sshll.u32 %s415_s19, 4  ;;  %s340_s23 = int_to_ptr.vmem [resolvable:$false] %s339_s23 }
  0x21   : > { %s341_s24 = scalar_lea.vmem %s340_s23, 256  ;;  %p342_p4 = scmp.lt.s32.totalorder %s503_s30, %s340_s23 }
  0x22   : > { %p337_p1 = pnand %p335_p0, %p323_p3  ;;  %p343_p12 = scmp.lt.s32.totalorder %s341_s24, %s334_s17 }
  0x24   : > { %p338_p2 = pneg %p337_p1  ;;  %p344_p11 = por %p343_p12, %p342_p4 }
  0x26   : > { %p345_p6 = pnand %p344_p11, %p338_p2 }
  0x28   : > { %348 = shalt.err (!%p345_p6)
}
  0x29   : > { %280 = dma.hbm_to_vmem [thread:$0]  (!%p499_p13), %s495_s28, 128, %s503_s30, %s113_s4  }
  0x2a   : > { %p586_p9 = scmp.lt.s32.totalorder %s413_s12, 3  ;;  %p587_p7 = scmp.ge.s32.totalorder %s413_s12, 1 }
  0x2c   : > { %p129_p0 = pnand %p587_p7, %p586_p9 }
  0x2d   : > { %s530_s25 = sand.u32 (!%p129_p0), 1, %s405_s10   ;;  %p588_p6 = scmp.ne.s32.totalorder (!%p129_p0), %s582_s20, 0 }
  0x2e   : > { %132 = sbr.rel (%p129_p0) target bundleno = 228 (0xe4), region = 28  ;;  %s266_s26 = sshll.u32 (!%p129_p0), %s530_s25, 3 }
  0x2f   : > { %s135_s27 = scalar_lea.sflag (!%p129_p0), [#allocation3], %s530_s25  ;;  %s138_s29 = scalar_lea.vmem (!%p129_p0), [#allocation2], %s266_s26 }
  0x33   : > { %392 = dma.done.wait (%p588_p6), %s135_s27, 128  }
  0x34   : > { %394 = vsyncadd (%p588_p6), %s135_s27, 4294967168  ;;  %v159_v0 = vld [vmem:[%s138_s29] sm:$0xff]  ;;  %s270_s3 = sshll.u32 %s453_s13, 7  ;;  %s158_s4 = scalar_lea.vmem [#allocation5], %s266_s26 }
  0x35   : > { %v160_v1 = vmul.f32 %v159_v0, %v159_v0  ;;  %v268_v6 = vld [vmem:[%s577_s1] ss:$0 sm:$0xff]  ;;  %s190_s5 = sshll.u32 %s158_s4, 4  ;;  %s188_s7 = scalar_lea.hbm %s578_s2, %s270_s3  ;;  %s191_s5 = int_to_ptr.vmem [resolvable:$true] %s190_s5 }
  0x36   : > { %s177_s8 = scalar_lea.sflag [#allocation4], %s530_s25  ;;  %s349_s14 = scalar_lea.vmem %s191_s5, 128 }
  0x37   : > { %161 = vadd.xlane.f32.xlu0 %v160_v1  ;;  %p350_p11 = scmp.ne.s32.totalorder %s191_s5, %s349_s14  ;;  %p589_p12 = scmp.ne.s32.totalorder %s583_s21, 0 }
  0x38   : > { %s416_s16 = smov [#allocation5]  }
  0x39   : > { %p351_p13 = pnand %p350_p11, %p589_p12  ;;  %s353_s17 = sshll.u32 %s416_s16, 4  ;;  %s354_s17 = int_to_ptr.vmem [resolvable:$false] %s353_s17 }
  0x3a   : > { %s355_s13 = scalar_lea.vmem %s354_s17, 256  ;;  %p356_p3 = scmp.lt.s32.totalorder %s191_s5, %s354_s17 }
  0x3b   : > { %p352_p1 = pneg %p351_p13  ;;  %p357_p5 = scmp.lt.s32.totalorder %s355_s13, %s349_s14 }
  0x3d   : > { %p358_p8 = por %p357_p5, %p356_p3 }
  0x3f   : > { %p359_p10 = pnand %p358_p8, %p352_p1 }
  0xc0   : > { %v162_v2 = vpop.xlane.xlu0 %161 }
  0xc1   : > { %v163_v3 = vmul.f32 0.0078125, %v162_v2 }
  0xc3   : > { %v164_v4 = vadd.f32 1e-05, %v163_v3 }
  0xc5   : > { %319 = vrsqrt.f32 %v164_v4 }
  0xd2   : > { %v320_v5 = vpop.eup %319 }
  0xd3   : > { %v166_v7 = vmul.f32 %v320_v5, %v159_v0 }
  0xd5   : > { %v174_v8 = vmul.f32 %v268_v6, %v166_v7 }
  0xd7   : > { %175 = vst [vmem:[%s158_s4] sm:$0xff] %v174_v8 }
  0xd8   : > { %362 = shalt.err (!%p359_p10)
}
  0xd9   : > { %s363_s19 = scalar_lea.hbm %s188_s7, 128  ;;  %s367_s25 = scalar_lea.hbm %s578_s2, 256 }
  0xda   : > { %p364_p2 = scmp.ne.s32.totalorder %s188_s7, %s363_s19  ;;  %p368_p7 = scmp.lt.s32.totalorder %s188_s7, %s578_s2 }
  0xdb   : > { %p369_p0 = scmp.lt.s32.totalorder %s367_s25, %s363_s19 }
  0xdc   : > { %p365_p4 = pnand %p364_p2, %p589_p12 }
  0xdd   : > { %p370_p6 = por %p369_p0, %p368_p7 }
  0xde   : > { %p366_p9 = pneg %p365_p4 }
  0xe0   : > { %p371_p11 = pnand %p370_p6, %p366_p9 }
  0xe2   : > { %374 = shalt.err (!%p371_p11)
}
  0xe3   : > { %275 = dma.vmem_to_hbm [thread:$0]  (%p589_p12), %s191_s5, 128, %s188_s7, %s177_s8  }
  0xe4 PF: > { %s202_s29 = sand.u32 1, %s401_s9   ;;  %p590_p13 = scmp.ne.s32.totalorder %s584_s22, 0 }
  0xe5   : > { %p591_p1 = scmp.ge.s32.totalorder %s413_s12, 2  ;;  %s203_s28 = scalar_lea.sflag [#allocation4], %s202_s29 }
  0xe7   : > { %p282_p3 = pnand %p591_p1, %p590_p13 }
  0xe9   : > { %p283_p5 = pneg %p282_p3 }
  0xeb   : > { %396 = dma.done.wait (%p283_p5), %s203_s28, 128  }
  0xec   : > { %398 = vsyncadd (%p283_p5), %s203_s28, 4294967168  ;;  %p15_p8 = scmp.ge.s32.totalorder %s457_s15, 4   ;;  %s592_s9 = smov %s405_s10 }
  0xed   : > { %s593_s10 = smov %s409_s11  ;;  %s594_s11 = smov %s469_s18 }
  0xee   : > { %s595_s12 = smov %s457_s15  ;;  %17 = sbr.rel (!%p15_p8) target bundleno = 5 (0x5), region = 73 }
  0xf3   :  { %208 = vsyncpa [#allocation3], 1 }
  0xf4   :  { %210 = vsyncpa [#allocation3 + $0x1], 1 }
  0xf5   :  { %211 = vsyncpa [#allocation4], 1 }
  0xf6   :  { %213 = vsyncpa [#allocation4 + $0x1], 1 }

</bundles_post_ra>
